<compile_context>
chip_gen: v7x
topology: tpu7x:2x2x1
jax: 0.10.0
libtpu: 0.0.40
codegen_flags: <defaults>
</compile_context>

<pallas_src>
import functools

import jax
import jax.numpy as jnp
from jax import lax
from jax.experimental import pallas as pl
from jax.experimental.pallas import tpu as pltpu

_EPS = 1e-5


def _mixture_bn_kernel(x_ref, adv_ref, gamma_ref, beta_ref,
                       clean_o_ref, adv_o_ref,
                       sum_ref, sq_ref, scale_ref, shift_ref,
                       *, inv_count):
    """Two-sweep fused BN.

    Grid = (sweep, tile).  sweep 0: accumulate sum / sumsq per (branch, C, L).
    sweep 1, tile 0: finalize per-channel scale/shift.  sweep 1: normalize.
    """
    sweep = pl.program_id(0)
    tile = pl.program_id(1)

    @pl.when(jnp.logical_and(sweep == 0, tile == 0))
    def _init():
        sum_ref[...] = jnp.zeros_like(sum_ref)
        sq_ref[...] = jnp.zeros_like(sq_ref)

    @pl.when(sweep == 0)
    def _accumulate():
        # One pass over the tile: per-(C, L) sum and sum-of-squares only.
        # axis=0 is the outer (batch-tile) dim, so these reductions are plain
        # vreg adds — no cross-lane/XLU work here.
        xc = x_ref[...].astype(jnp.float32)                     # (TN, C, L)
        xa = adv_ref[...].astype(jnp.float32)
        sum_ref[0] = sum_ref[0] + jnp.sum(xc, axis=0)           # (C, L)
        sq_ref[0] = sq_ref[0] + jnp.sum(xc * xc, axis=0)
        sum_ref[1] = sum_ref[1] + jnp.sum(xa, axis=0)
        sq_ref[1] = sq_ref[1] + jnp.sum(xa * xa, axis=0)

    @pl.when(jnp.logical_and(sweep == 1, tile == 0))
    def _finalize_stats():
        # Lane reduction (XLU) + rsqrt (EUP): done exactly once.
        mean = jnp.sum(sum_ref[...], axis=2, keepdims=True) * inv_count  # (2,C,1)
        ex2 = jnp.sum(sq_ref[...], axis=2, keepdims=True) * inv_count    # (2,C,1)
        var = jnp.maximum(ex2 - mean * mean, 0.0)     # biased variance
        inv_std = lax.rsqrt(var + _EPS)
        scale = inv_std * gamma_ref[...]              # (2, C, 1)
        scale_ref[...] = scale
        shift_ref[...] = beta_ref[...] - mean * scale

    @pl.when(sweep == 1)
    def _normalize():
        xc = x_ref[...].astype(jnp.float32)           # (TN, C, L)
        xa = adv_ref[...].astype(jnp.float32)
        clean_o_ref[...] = (xc * scale_ref[0:1] + shift_ref[0:1]).astype(clean_o_ref.dtype)
        adv_o_ref[...] = (xa * scale_ref[1:2] + shift_ref[1:2]).astype(adv_o_ref.dtype)


def _pick_tile_rows(n, c, l, itemsize, target_bytes=1 << 20):
    """Largest divisor of n whose (rows, C, L) tile stays under target_bytes.

    Keeping each tile <= ~1 MiB means 2 inputs + 2 outputs, double-buffered,
    stay under ~8 MiB of VMEM — safe on every generation (v5e/v6e/v7x) with
    the 32 MiB scoped limit requested below, leaving room for the stats
    scratch even at large C*L.
    """
    row_bytes = max(1, c * l * itemsize)
    best = 1
    for d in range(1, n + 1):
        if n % d == 0 and d * row_bytes <= target_bytes:
            best = d
    return best


def mixture_bn_forward(x, adv_x, params, tile_rows=None):
    """x, adv_x: (N, C, L) in PyTorch's NCL convention."""
    N, C, L = x.shape
    assert adv_x.shape == (N, C, L)

    # Stack the tiny per-channel params for both branches: row 0 = clean, 1 = adv.
    gamma = jnp.stack([params["clean_gamma"], params["adv_gamma"]], axis=0)
    beta = jnp.stack([params["clean_beta"], params["adv_beta"]], axis=0)
    gamma = gamma.astype(jnp.float32).reshape(2, C, 1)
    beta = beta.astype(jnp.float32).reshape(2, C, 1)

    itemsize = jnp.dtype(x.dtype).itemsize
    if tile_rows is None:
        tile_rows = _pick_tile_rows(N, C, L, itemsize)
    if N % tile_rows != 0:
        raise ValueError(f"tile_rows={tile_rows} must divide N={N}")
    nt = N // tile_rows

    # Output index_map (sweep * tile): during the stats sweep all iterations
    # map to block 0, so the (unwritten) output block stays resident and is
    # only written back after sweep 1 fills it with real data.
    x_spec = pl.BlockSpec((tile_rows, C, L), lambda s, t: (t, 0, 0))
    o_spec = pl.BlockSpec((tile_rows, C, L), lambda s, t: (s * t, 0, 0))
    p_spec = pl.BlockSpec((2, C, 1), lambda s, t: (0, 0, 0))

    kernel = functools.partial(_mixture_bn_kernel, inv_count=1.0 / float(N * L))

    clean_out, adv_out = pl.pallas_call(
        kernel,
        out_shape=(
            jax.ShapeDtypeStruct((N, C, L), x.dtype),
            jax.ShapeDtypeStruct((N, C, L), adv_x.dtype),
        ),
        grid_spec=pltpu.PrefetchScalarGridSpec(
            num_scalar_prefetch=0,
            grid=(2, nt),                       # (sweep, tile)
            in_specs=[x_spec, x_spec, p_spec, p_spec],
            out_specs=[o_spec, o_spec],
            scratch_shapes=[
                pltpu.VMEM((2, C, L), jnp.float32),   # partial sums   (branch, C, L)
                pltpu.VMEM((2, C, L), jnp.float32),   # partial sumsq
                pltpu.VMEM((2, C, 1), jnp.float32),   # scale = gamma * inv_std
                pltpu.VMEM((2, C, 1), jnp.float32),   # shift = beta - mean * scale
            ],
        ),
        compiler_params=pltpu.CompilerParams(
            dimension_semantics=("arbitrary", "arbitrary"),
            vmem_limit_bytes=32 << 20,
        ),
        cost_estimate=pl.CostEstimate(
            flops=10 * N * C * L,
            transcendentals=2 * C,
            bytes_accessed=2 * 3 * N * C * L * itemsize,
        ),
    )(x, adv_x, gamma, beta)

    return clean_out, adv_out


def _reference_bn(inp, gamma, beta):
    """Pure-JAX reference: training-mode BatchNorm1d over (N, C, L)."""
    mean = jnp.mean(inp, axis=(0, 2), keepdims=True)
    var = jnp.mean((inp - mean) ** 2, axis=(0, 2), keepdims=True)
    g = gamma.reshape(1, -1, 1)
    b = beta.reshape(1, -1, 1)
    return (inp - mean) * lax.rsqrt(var + _EPS) * g + b


if __name__ == "__main__":
    key = jax.random.PRNGKey(0)
    k_x, k_adv, k_g1, k_b1, k_g2, k_b2 = jax.random.split(key, 6)

    N, C, L = 8, 4, 16  # num_features = C = 4
    x = jax.random.normal(k_x, (N, C, L), dtype=jnp.float32)
    adv_x = jax.random.normal(k_adv, (N, C, L), dtype=jnp.float32)

    # PyTorch init is weight=1, bias=0; perturb deterministically so the affine
    # path is actually exercised.
    params = {
        "clean_gamma": 1.0 + 0.1 * jax.random.normal(k_g1, (C,), jnp.float32),
        "clean_beta": 0.1 * jax.random.normal(k_b1, (C,), jnp.float32),
        "adv_gamma": 1.0 + 0.1 * jax.random.normal(k_g2, (C,), jnp.float32),
        "adv_beta": 0.1 * jax.random.normal(k_b2, (C,), jnp.float32),
    }

    # Path 1: auto tile size (whole array resident, nt == 1 -> 1 read + 1 write).
    clean_out, adv_out = jax.block_until_ready(mixture_bn_forward(x, adv_x, params))
    # Path 2: forced multi-tile two-sweep pipeline (nt == 4) to exercise tiling.
    clean_t, adv_t = jax.block_until_ready(
        mixture_bn_forward(x, adv_x, params, tile_rows=2)
    )

    ref_clean = _reference_bn(x, params["clean_gamma"], params["clean_beta"])
    ref_adv = _reference_bn(adv_x, params["adv_gamma"], params["adv_beta"])
    for got_clean, got_adv in ((clean_out, adv_out), (clean_t, adv_t)):
        assert jnp.allclose(got_clean, ref_clean, atol=1e-4, rtol=1e-4)
        assert jnp.allclose(got_adv, ref_adv, atol=1e-4, rtol=1e-4)

    print("KERNEL_OK")
</pallas_src>

<mosaic_0001>
module attributes {stable_mosaic.version = 11 : i64} {
  func.func @_mixture_bn_kernel(%arg0: i32, %arg1: i32, %arg2: memref<8x4x16xf32, #tpu.memory_space<vmem>>, %arg3: memref<8x4x16xf32, #tpu.memory_space<vmem>>, %arg4: memref<2x4x1xf32, #tpu.memory_space<vmem>>, %arg5: memref<2x4x1xf32, #tpu.memory_space<vmem>>, %arg6: memref<8x4x16xf32, #tpu.memory_space<vmem>>, %arg7: memref<8x4x16xf32, #tpu.memory_space<vmem>>, %arg8: memref<2x4x16xf32, #tpu.memory_space<vmem>>, %arg9: memref<2x4x16xf32, #tpu.memory_space<vmem>>, %arg10: memref<2x4x1xf32, #tpu.memory_space<vmem>>, %arg11: memref<2x4x1xf32, #tpu.memory_space<vmem>>) attributes {dimension_semantics = [#tpu.dimension_semantics<arbitrary>, #tpu.dimension_semantics<arbitrary>], iteration_bounds = array<i64: 2, 1>, scalar_prefetch = 0 : i64, scratch_operands = 4 : i64, tpu.core_type = #tpu.core_type<tc>, window_params = [{transform_indices = @transform_0, window_bounds = array<i64: 8, 4, 16>}, {transform_indices = @transform_1, window_bounds = array<i64: 8, 4, 16>}, {pipeline_mode = #tpu.pipeline_mode<synchronous>, transform_indices = @transform_2, window_bounds = array<i64: 2, 4, 1>}, {pipeline_mode = #tpu.pipeline_mode<synchronous>, transform_indices = @transform_3, window_bounds = array<i64: 2, 4, 1>}, {transform_indices = @transform_4, window_bounds = array<i64: 8, 4, 16>}, {transform_indices = @transform_5, window_bounds = array<i64: 8, 4, 16>}]} {
    %c0_i32 = arith.constant 0 : i32
    %0 = arith.cmpi eq, %arg0, %c0_i32 : i32
    %c0_i32_0 = arith.constant 0 : i32
    %1 = arith.cmpi eq, %arg1, %c0_i32_0 : i32
    %2 = arith.andi %0, %1 : i1
    %3 = arith.extui %2 : i1 to i32
    %c0_i32_1 = arith.constant 0 : i32
    %4 = arith.cmpi ne, %3, %c0_i32_1 : i32
    scf.if %4 {
      %cst = arith.constant 0.000000e+00 : f32
      %16 = vector.broadcast %cst : f32 to vector<2x4x16xf32>
      %c0 = arith.constant 0 : index
      %c0_8 = arith.constant 0 : index
      %c0_9 = arith.constant 0 : index
      %17 = vector.load %arg8[%c0, %c0_8, %c0_9] : memref<2x4x16xf32, #tpu.memory_space<vmem>>, vector<2x4x16xf32>
      tpu.vector_store %arg8[%c0, %c0_8, %c0_9], %16 {strides = array<i32>} : memref<2x4x16xf32, #tpu.memory_space<vmem>>, vector<2x4x16xf32>,
      %cst_10 = arith.constant 0.000000e+00 : f32
      %18 = vector.broadcast %cst_10 : f32 to vector<2x4x16xf32>
      %c0_11 = arith.constant 0 : index
      %c0_12 = arith.constant 0 : index
      %c0_13 = arith.constant 0 : index
      %19 = vector.load %arg9[%c0_11, %c0_12, %c0_13] : memref<2x4x16xf32, #tpu.memory_space<vmem>>, vector<2x4x16xf32>
      tpu.vector_store %arg9[%c0_11, %c0_12, %c0_13], %18 {strides = array<i32>} : memref<2x4x16xf32, #tpu.memory_space<vmem>>, vector<2x4x16xf32>,
    } else {
    }
    %c0_i32_2 = arith.constant 0 : i32
    %5 = arith.cmpi eq, %arg0, %c0_i32_2 : i32
    %6 = arith.extui %5 : i1 to i32
    %c0_i32_3 = arith.constant 0 : i32
    %7 = arith.cmpi ne, %6, %c0_i32_3 : i32
    scf.if %7 {
      %c0 = arith.constant 0 : index
      %c0_8 = arith.constant 0 : index
      %c0_9 = arith.constant 0 : index
      %16 = vector.load %arg2[%c0, %c0_8, %c0_9] : memref<8x4x16xf32, #tpu.memory_space<vmem>>, vector<8x4x16xf32>
      %c0_10 = arith.constant 0 : index
      %c0_11 = arith.constant 0 : index
      %c0_12 = arith.constant 0 : index
      %17 = vector.load %arg3[%c0_10, %c0_11, %c0_12] : memref<8x4x16xf32, #tpu.memory_space<vmem>>, vector<8x4x16xf32>
      %c0_13 = arith.constant 0 : index
      %c0_14 = arith.constant 0 : index
      %c0_15 = arith.constant 0 : index
      %18 = vector.load %arg8[%c0_13, %c0_14, %c0_15] : memref<2x4x16xf32, #tpu.memory_space<vmem>>, vector<1x4x16xf32>
      %19 = vector.shape_cast %18 : vector<1x4x16xf32> to vector<4x16xf32>
      %cst = arith.constant dense<0.000000e+00> : vector<4x16xf32>
      %20 = vector.multi_reduction <add>, %16, %cst [0] : vector<8x4x16xf32> to vector<4x16xf32>
      %21 = arith.addf %19, %20 : vector<4x16xf32>
      %c0_16 = arith.constant 0 : index
      %c0_17 = arith.constant 0 : index
      %c0_18 = arith.constant 0 : index
      %22 = vector.load %arg8[%c0_16, %c0_17, %c0_18] : memref<2x4x16xf32, #tpu.memory_space<vmem>>, vector<1x4x16xf32>
      %23 = vector.shape_cast %22 : vector<1x4x16xf32> to vector<4x16xf32>
      %24 = vector.shape_cast %21 : vector<4x16xf32> to vector<1x4x16xf32>
      tpu.vector_store %arg8[%c0_16, %c0_17, %c0_18], %24 {strides = array<i32>} : memref<2x4x16xf32, #tpu.memory_space<vmem>>, vector<1x4x16xf32>,
      %c0_19 = arith.constant 0 : index
      %c0_20 = arith.constant 0 : index
      %c0_21 = arith.constant 0 : index
      %25 = vector.load %arg9[%c0_19, %c0_20, %c0_21] : memref<2x4x16xf32, #tpu.memory_space<vmem>>, vector<1x4x16xf32>
      %26 = vector.shape_cast %25 : vector<1x4x16xf32> to vector<4x16xf32>
      %27 = arith.mulf %16, %16 : vector<8x4x16xf32>
      %cst_22 = arith.constant dense<0.000000e+00> : vector<4x16xf32>
      %28 = vector.multi_reduction <add>, %27, %cst_22 [0] : vector<8x4x16xf32> to vector<4x16xf32>
      %29 = arith.addf %26, %28 : vector<4x16xf32>
      %c0_23 = arith.constant 0 : index
      %c0_24 = arith.constant 0 : index
      %c0_25 = arith.constant 0 : index
      %30 = vector.load %arg9[%c0_23, %c0_24, %c0_25] : memref<2x4x16xf32, #tpu.memory_space<vmem>>, vector<1x4x16xf32>
      %31 = vector.shape_cast %30 : vector<1x4x16xf32> to vector<4x16xf32>
      %32 = vector.shape_cast %29 : vector<4x16xf32> to vector<1x4x16xf32>
      tpu.vector_store %arg9[%c0_23, %c0_24, %c0_25], %32 {strides = array<i32>} : memref<2x4x16xf32, #tpu.memory_space<vmem>>, vector<1x4x16xf32>,
      %c1 = arith.constant 1 : index
      %c0_26 = arith.constant 0 : index
      %c0_27 = arith.constant 0 : index
      %33 = vector.load %arg8[%c1, %c0_26, %c0_27] : memref<2x4x16xf32, #tpu.memory_space<vmem>>, vector<1x4x16xf32>
      %34 = vector.shape_cast %33 : vector<1x4x16xf32> to vector<4x16xf32>
      %cst_28 = arith.constant dense<0.000000e+00> : vector<4x16xf32>
      %35 = vector.multi_reduction <add>, %17, %cst_28 [0] : vector<8x4x16xf32> to vector<4x16xf32>
      %36 = arith.addf %34, %35 : vector<4x16xf32>
      %c1_29 = arith.constant 1 : index
      %c0_30 = arith.constant 0 : index
      %c0_31 = arith.constant 0 : index
      %37 = vector.load %arg8[%c1_29, %c0_30, %c0_31] : memref<2x4x16xf32, #tpu.memory_space<vmem>>, vector<1x4x16xf32>
      %38 = vector.shape_cast %37 : vector<1x4x16xf32> to vector<4x16xf32>
      %39 = vector.shape_cast %36 : vector<4x16xf32> to vector<1x4x16xf32>
      tpu.vector_store %arg8[%c1_29, %c0_30, %c0_31], %39 {strides = array<i32>} : memref<2x4x16xf32, #tpu.memory_space<vmem>>, vector<1x4x16xf32>,
      %c1_32 = arith.constant 1 : index
      %c0_33 = arith.constant 0 : index
      %c0_34 = arith.constant 0 : index
      %40 = vector.load %arg9[%c1_32, %c0_33, %c0_34] : memref<2x4x16xf32, #tpu.memory_space<vmem>>, vector<1x4x16xf32>
      %41 = vector.shape_cast %40 : vector<1x4x16xf32> to vector<4x16xf32>
      %42 = arith.mulf %17, %17 : vector<8x4x16xf32>
      %cst_35 = arith.constant dense<0.000000e+00> : vector<4x16xf32>
      %43 = vector.multi_reduction <add>, %42, %cst_35 [0] : vector<8x4x16xf32> to vector<4x16xf32>
      %44 = arith.addf %41, %43 : vector<4x16xf32>
      %c1_36 = arith.constant 1 : index
      %c0_37 = arith.constant 0 : index
      %c0_38 = arith.constant 0 : index
      %45 = vector.load %arg9[%c1_36, %c0_37, %c0_38] : memref<2x4x16xf32, #tpu.memory_space<vmem>>, vector<1x4x16xf32>
      %46 = vector.shape_cast %45 : vector<1x4x16xf32> to vector<4x16xf32>
      %47 = vector.shape_cast %44 : vector<4x16xf32> to vector<1x4x16xf32>
      tpu.vector_store %arg9[%c1_36, %c0_37, %c0_38], %47 {strides = array<i32>} : memref<2x4x16xf32, #tpu.memory_space<vmem>>, vector<1x4x16xf32>,
    } else {
    }
    %c1_i32 = arith.constant 1 : i32
    %8 = arith.cmpi eq, %arg0, %c1_i32 : i32
    %c0_i32_4 = arith.constant 0 : i32
    %9 = arith.cmpi eq, %arg1, %c0_i32_4 : i32
    %10 = arith.andi %8, %9 : i1
    %11 = arith.extui %10 : i1 to i32
    %c0_i32_5 = arith.constant 0 : i32
    %12 = arith.cmpi ne, %11, %c0_i32_5 : i32
    scf.if %12 {
      %c0 = arith.constant 0 : index
      %c0_8 = arith.constant 0 : index
      %c0_9 = arith.constant 0 : index
      %16 = vector.load %arg8[%c0, %c0_8, %c0_9] : memref<2x4x16xf32, #tpu.memory_space<vmem>>, vector<2x4x16xf32>
      %cst = arith.constant dense<0.000000e+00> : vector<2x4xf32>
      %17 = vector.multi_reduction <add>, %16, %cst [2] : vector<2x4x16xf32> to vector<2x4xf32>
      %18 = vector.shape_cast %17 : vector<2x4xf32> to vector<2x4x1xf32>
      %cst_10 = arith.constant 7.812500e-03 : f32
      %19 = vector.broadcast %cst_10 : f32 to vector<2x4x1xf32>
      %20 = arith.mulf %18, %19 : vector<2x4x1xf32>
      %c0_11 = arith.constant 0 : index
      %c0_12 = arith.constant 0 : index
      %c0_13 = arith.constant 0 : index
      %21 = vector.load %arg9[%c0_11, %c0_12, %c0_13] : memref<2x4x16xf32, #tpu.memory_space<vmem>>, vector<2x4x16xf32>
      %cst_14 = arith.constant dense<0.000000e+00> : vector<2x4xf32>
      %22 = vector.multi_reduction <add>, %21, %cst_14 [2] : vector<2x4x16xf32> to vector<2x4xf32>
      %23 = vector.shape_cast %22 : vector<2x4xf32> to vector<2x4x1xf32>
      %cst_15 = arith.constant 7.812500e-03 : f32
      %24 = vector.broadcast %cst_15 : f32 to vector<2x4x1xf32>
      %25 = arith.mulf %23, %24 : vector<2x4x1xf32>
      %26 = arith.mulf %20, %20 : vector<2x4x1xf32>
      %27 = arith.subf %25, %26 : vector<2x4x1xf32>
      %cst_16 = arith.constant 0.000000e+00 : f32
      %28 = vector.broadcast %cst_16 : f32 to vector<2x4x1xf32>
      %29 = arith.maximumf %27, %28 : vector<2x4x1xf32>
      %cst_17 = arith.constant 9.99999974E-6 : f32
      %30 = vector.broadcast %cst_17 : f32 to vector<2x4x1xf32>
      %31 = arith.addf %29, %30 : vector<2x4x1xf32>
      %32 = math.rsqrt %31 : vector<2x4x1xf32>
      %c0_18 = arith.constant 0 : index
      %c0_19 = arith.constant 0 : index
      %c0_20 = arith.constant 0 : index
      %33 = vector.load %arg4[%c0_18, %c0_19, %c0_20] : memref<2x4x1xf32, #tpu.memory_space<vmem>>, vector<2x4x1xf32>
      %34 = arith.mulf %32, %33 : vector<2x4x1xf32>
      %c0_21 = arith.constant 0 : index
      %c0_22 = arith.constant 0 : index
      %c0_23 = arith.constant 0 : index
      %35 = vector.load %arg10[%c0_21, %c0_22, %c0_23] : memref<2x4x1xf32, #tpu.memory_space<vmem>>, vector<2x4x1xf32>
      tpu.vector_store %arg10[%c0_21, %c0_22, %c0_23], %34 {strides = array<i32>} : memref<2x4x1xf32, #tpu.memory_space<vmem>>, vector<2x4x1xf32>,
      %c0_24 = arith.constant 0 : index
      %c0_25 = arith.constant 0 : index
      %c0_26 = arith.constant 0 : index
      %36 = vector.load %arg5[%c0_24, %c0_25, %c0_26] : memref<2x4x1xf32, #tpu.memory_space<vmem>>, vector<2x4x1xf32>
      %37 = arith.mulf %20, %34 : vector<2x4x1xf32>
      %38 = arith.subf %36, %37 : vector<2x4x1xf32>
      %c0_27 = arith.constant 0 : index
      %c0_28 = arith.constant 0 : index
      %c0_29 = arith.constant 0 : index
      %39 = vector.load %arg11[%c0_27, %c0_28, %c0_29] : memref<2x4x1xf32, #tpu.memory_space<vmem>>, vector<2x4x1xf32>
      tpu.vector_store %arg11[%c0_27, %c0_28, %c0_29], %38 {strides = array<i32>} : memref<2x4x1xf32, #tpu.memory_space<vmem>>, vector<2x4x1xf32>,
    } else {
    }
    %c1_i32_6 = arith.constant 1 : i32
    %13 = arith.cmpi eq, %arg0, %c1_i32_6 : i32
    %14 = arith.extui %13 : i1 to i32
    %c0_i32_7 = arith.constant 0 : i32
    %15 = arith.cmpi ne, %14, %c0_i32_7 : i32
    scf.if %15 {
      %c0 = arith.constant 0 : index
      %c0_8 = arith.constant 0 : index
      %c0_9 = arith.constant 0 : index
      %16 = vector.load %arg2[%c0, %c0_8, %c0_9] : memref<8x4x16xf32, #tpu.memory_space<vmem>>, vector<8x4x16xf32>
      %c0_10 = arith.constant 0 : index
      %c0_11 = arith.constant 0 : index
      %c0_12 = arith.constant 0 : index
      %17 = vector.load %arg3[%c0_10, %c0_11, %c0_12] : memref<8x4x16xf32, #tpu.memory_space<vmem>>, vector<8x4x16xf32>
      %c0_13 = arith.constant 0 : index
      %c0_14 = arith.constant 0 : index
      %c0_15 = arith.constant 0 : index
      %18 = vector.load %arg10[%c0_13, %c0_14, %c0_15] : memref<2x4x1xf32, #tpu.memory_space<vmem>>, vector<1x4x1xf32>
      %19 = vector.broadcast %18 : vector<1x4x1xf32> to vector<8x4x16xf32>
      %20 = arith.mulf %16, %19 : vector<8x4x16xf32>
      %c0_16 = arith.constant 0 : index
      %c0_17 = arith.constant 0 : index
      %c0_18 = arith.constant 0 : index
      %21 = vector.load %arg11[%c0_16, %c0_17, %c0_18] : memref<2x4x1xf32, #tpu.memory_space<vmem>>, vector<1x4x1xf32>
      %22 = vector.broadcast %21 : vector<1x4x1xf32> to vector<8x4x16xf32>
      %23 = arith.addf %20, %22 : vector<8x4x16xf32>
      %c0_19 = arith.constant 0 : index
      %c0_20 = arith.constant 0 : index
      %c0_21 = arith.constant 0 : index
      %24 = vector.load %arg6[%c0_19, %c0_20, %c0_21] : memref<8x4x16xf32, #tpu.memory_space<vmem>>, vector<8x4x16xf32>
      tpu.vector_store %arg6[%c0_19, %c0_20, %c0_21], %23 {strides = array<i32>} : memref<8x4x16xf32, #tpu.memory_space<vmem>>, vector<8x4x16xf32>,
      %c1 = arith.constant 1 : index
      %c0_22 = arith.constant 0 : index
      %c0_23 = arith.constant 0 : index
      %25 = vector.load %arg10[%c1, %c0_22, %c0_23] : memref<2x4x1xf32, #tpu.memory_space<vmem>>, vector<1x4x1xf32>
      %26 = vector.broadcast %25 : vector<1x4x1xf32> to vector<8x4x16xf32>
      %27 = arith.mulf %17, %26 : vector<8x4x16xf32>
      %c1_24 = arith.constant 1 : index
      %c0_25 = arith.constant 0 : index
      %c0_26 = arith.constant 0 : index
      %28 = vector.load %arg11[%c1_24, %c0_25, %c0_26] : memref<2x4x1xf32, #tpu.memory_space<vmem>>, vector<1x4x1xf32>
      %29 = vector.broadcast %28 : vector<1x4x1xf32> to vector<8x4x16xf32>
      %30 = arith.addf %27, %29 : vector<8x4x16xf32>
      %c0_27 = arith.constant 0 : index
      %c0_28 = arith.constant 0 : index
      %c0_29 = arith.constant 0 : index
      %31 = vector.load %arg7[%c0_27, %c0_28, %c0_29] : memref<8x4x16xf32, #tpu.memory_space<vmem>>, vector<8x4x16xf32>
      tpu.vector_store %arg7[%c0_27, %c0_28, %c0_29], %30 {strides = array<i32>} : memref<8x4x16xf32, #tpu.memory_space<vmem>>, vector<8x4x16xf32>,
    } else {
    }
    return
  }
  func.func @transform_0(%arg0: i32, %arg1: i32) -> (i32, i32, i32) {
    %c0_i32 = arith.constant 0 : i32
    %c0_i32_0 = arith.constant 0 : i32
    %c0_i32_1 = arith.constant 0 : i32
    return %arg1, %c0_i32, %c0_i32_0 : i32, i32, i32
  }
  func.func @transform_1(%arg0: i32, %arg1: i32) -> (i32, i32, i32) {
    %c0_i32 = arith.constant 0 : i32
    %c0_i32_0 = arith.constant 0 : i32
    %c0_i32_1 = arith.constant 0 : i32
    return %arg1, %c0_i32, %c0_i32_0 : i32, i32, i32
  }
  func.func @transform_2(%arg0: i32, %arg1: i32) -> (i32, i32, i32) {
    %c0_i32 = arith.constant 0 : i32
    %c0_i32_0 = arith.constant 0 : i32
    %c0_i32_1 = arith.constant 0 : i32
    %c0_i32_2 = arith.constant 0 : i32
    return %c0_i32, %c0_i32_0, %c0_i32_1 : i32, i32, i32
  }
  func.func @transform_3(%arg0: i32, %arg1: i32) -> (i32, i32, i32) {
    %c0_i32 = arith.constant 0 : i32
    %c0_i32_0 = arith.constant 0 : i32
    %c0_i32_1 = arith.constant 0 : i32
    %c0_i32_2 = arith.constant 0 : i32
    return %c0_i32, %c0_i32_0, %c0_i32_1 : i32, i32, i32
  }
  func.func @transform_4(%arg0: i32, %arg1: i32) -> (i32, i32, i32) {
    %0 = arith.muli %arg0, %arg1 : i32
    %c0_i32 = arith.constant 0 : i32
    %c0_i32_0 = arith.constant 0 : i32
    %c0_i32_1 = arith.constant 0 : i32
    return %0, %c0_i32, %c0_i32_0 : i32, i32, i32
  }
  func.func @transform_5(%arg0: i32, %arg1: i32) -> (i32, i32, i32) {
    %0 = arith.muli %arg0, %arg1 : i32
    %c0_i32 = arith.constant 0 : i32
    %c0_i32_0 = arith.constant 0 : i32
    %c0_i32_1 = arith.constant 0 : i32
    return %0, %c0_i32, %c0_i32_0 : i32, i32, i32
  }
}

</mosaic_0001>

<bundles_post_ra>
// kernel: tpu_custom_call.1
= control target key start
LH: loop header
LB: loop body
LE: loop exit
PB: predicated region body
PF: predicated region fallthrough
CT: control target
= control target key end

     0   :  { %11 = vsyncpa [#allocation7], 0  ;;  %s1209_s0 = inlined_call_operand.hbm [shape: f32[8,4,16], index: 0, kind: input, shape index: {}]   ;;  %s1210_s1 = inlined_call_operand.hbm [shape: f32[8,4,16], index: 1, kind: input, shape index: {}]   ;;  %s1211_s2 = inlined_call_operand.vmem [shape: f32[2,4,1], index: 2, kind: input, shape index: {}]   ;;  %s1212_s3 = inlined_call_operand.vmem [shape: f32[2,4,1], index: 3, kind: input, shape index: {}]   ;;  %s1213_s4 = inlined_call_operand.hbm [shape: f32[8,4,16], index: 4, kind: output, shape index: {0}]   ;;  %s1214_s5 = inlined_call_operand.hbm [shape: f32[8,4,16], index: 5, kind: output, shape index: {1}]  }
   0x1   :  { %12 = vsyncpa [#allocation10], 0 }
   0x2   :  { %13 = vsyncpa [#allocation8], 0 }
   0x3   :  { %15 = vsyncpa [#allocation8 + $0x1], 0 }
   0x4   :  { %16 = vsyncpa [#allocation13], 0 }
   0x5   :  { %18 = vsyncpa [#allocation13 + $0x1], 0  ;;  %s988_s18 = smov 0   ;;  %s990_s19 = smov 0  }
   0x6   :  { %s992_s20 = smov 0  }
   0x7 LB: > { %s701_s21 = sadd.s32 4294967295, %s946_s20   ;;  %s702_s22 = sadd.s32 4294967294, %s946_s20   ;;  %s946_s20 = sphi %s992_s20, %s24_s20   ;;  %s942_s19 = sphi %s990_s19, %s1225_s19   ;;  %s938_s18 = sphi %s988_s18, %s1224_s18  }
   0x8   : > { %s36_s23 = sadd.s32 1, %s942_s19  ;;  %p703_p0 = scmp.ge.s32.totalorder %s946_s20, 1 }
   0x9   : > { %p38_p1 = scmp.ge.s32.totalorder %s36_s23, 2  ;;  %p191_p2 = scmp.lt.s32.totalorder %s946_s20, 3 }
   0xa   : > { %p1010_p3 = scmp.eq.s32.totalorder %s701_s21, 0  ;;  %s948_s26 = smov [#allocation6]  }
   0xb   : > { %s1227_s23 = smov (%p38_p1, %s36_s23), 0  ;;  %p1016_p4 = pnand %p703_p0, %p191_p2 }
   0xc   : > { %s1218_s24 = scalar_select %p1010_p3, 1, 0 }
   0xd   : > { %s1219_s25 = scalar_select %p1016_p4, 1, 0 }
   0xe   : > { %s206_s27 = sshll.u32 %s948_s26, 4  ;;  %p737_p5 = pneg %p1016_p4  ;;  %s207_s27 = int_to_ptr.vmem [resolvable:$true] %s206_s27 }
   0xf   : > { %s949_s29 = smov [#allocation9]   ;;  %s800_s8 = scalar_lea.hbm %s1209_s0, 512 }
  0x10   : > { %p1024_p6 = pnand %p1010_p3, %p737_p5  ;;  %s222_s30 = sshll.u32 %s949_s29, 4  ;;  %s1028_s30 = int_to_ptr.vmem [resolvable:$true] %s222_s30 }
  0x11   : > { %p801_p7 = scmp.ne.s32.totalorder %s1209_s0, %s800_s8  ;;  %p807_p11 = scmp.lt.u32.totalorder %s800_s8, %s1209_s0 }
  0x12   : > { %p802_p8 = pneg %p1024_p6 }
  0x14   : > { %p803_p9 = pnand %p802_p8, %p801_p7 }
  0x16   : > { %p804_p10 = pneg %p803_p9 }
  0x18   : > { %p809_p12 = pnand %p807_p11, %p804_p10 }
  0x1a   : > { %812 = shalt.err (!%p809_p12)
}
  0x1b   : > { %s813_s13 = scalar_lea.vmem %s207_s27, 512  ;;  %p821_p2 = scmp.lt.s32.totalorder %s207_s27, %s207_s27 }
  0x1c   : > { %p814_p13 = scmp.ne.s32.totalorder %s207_s27, %s813_s13  ;;  %p822_p5 = scmp.lt.s32.totalorder %s813_s13, %s813_s13 }
  0x1e   : > { %p816_p0 = pnand %p814_p13, %p802_p8  ;;  %p823_p3 = por %p822_p5, %p821_p2 }
  0x20   : > { %p817_p1 = pneg %p816_p0 }
  0x22   : > { %p824_p4 = pnand %p823_p3, %p817_p1 }
  0x24   : > { %827 = shalt.err (!%p824_p4)
}
  0x25   : > { %s950_s14 = smov 64   ;;  %s951_s15 = smov 4  }
  0x26   : > { %740 = dma.hbm_to_vmem [thread:$0]  (!%p1024_p6), %s1209_s0, 512, %s207_s27, [#allocation7], %s950_s14, %s950_s14, %s951_s15  }
  0x27   : > { %s828_s6 = scalar_lea.hbm %s1210_s1, 512 }
  0x28   : > { %p829_p7 = scmp.ne.s32.totalorder %s1210_s1, %s828_s6  ;;  %p835_p9 = scmp.lt.u32.totalorder %s828_s6, %s1210_s1 }
  0x2a   : > { %p831_p3 = pnand %p829_p7, %p802_p8 }
  0x2c   : > { %p832_p4 = pneg %p831_p3 }
  0x2e   : > { %p837_p10 = pnand %p835_p9, %p832_p4 }
  0x30   : > { %840 = shalt.err (!%p837_p10)
}
  0x31   : > { %s841_s27 = scalar_lea.vmem %s1028_s30, 512  ;;  %p849_p0 = scmp.lt.s32.totalorder %s1028_s30, %s1028_s30 }
  0x32   : > { %p842_p11 = scmp.ne.s32.totalorder %s1028_s30, %s841_s27  ;;  %p850_p1 = scmp.lt.s32.totalorder %s841_s27, %s841_s27 }
  0x34   : > { %p844_p12 = pnand %p842_p11, %p802_p8  ;;  %p851_p2 = por %p850_p1, %p849_p0 }
  0x36   : > { %p845_p13 = pneg %p844_p12 }
  0x38   : > { %p852_p5 = pnand %p851_p2, %p845_p13 }
  0x3a   : > { %855 = shalt.err (!%p852_p5)
}
  0x3b   : > { %743 = dma.hbm_to_vmem [thread:$0]  (!%p1024_p6), %s1210_s1, 512, %s1028_s30, [#allocation10], %s950_s14, %s950_s14, %s951_s15  }
  0x3c   : > { %p1221_p7 = scmp.ne.s32.totalorder %s1219_s25, 0 }
  0x3d   : > { %p1222_p3 = scmp.ne.s32.totalorder (!%p1221_p7), %s1218_s24, 0 }
  0x3e   : > { %244 = sbr.rel (%p1221_p7) target bundleno = 481 (0x1e1), region = 36 }
  0x45   : > { %921 = dma.done.wait (%p1222_p3), [#allocation7], 512  }
  0x46   : > { %923 = vsyncadd (%p1222_p3), [#allocation7], 4294966784 }
  0x47   : > { %925 = dma.done.wait (%p1222_p3), [#allocation10], 512  }
  0x48   : > { %927 = vsyncadd (%p1222_p3), [#allocation10], 4294966784  ;;  %p282_p8 = scmp.eq.s32.totalorder %s938_s18, 0 }
  0x49   : > { %vm288_vm0 = vcmask (%p282_p8), 125952   ;;  %v952_v0 = vmov (%p282_p8), 0.0  }
  0x4a   : > { %287 = sbr.rel (!%p282_p8) target bundleno = 81 (0x51), region = 48  ;;  %289 = vst.msk [vmem:[#allocation2] sm:$0xf] (%p282_p8), %vm288_vm0, %v952_v0  ;;  %290 = vst.msk [vmem:[#allocation2 + $0x4] sm:$0xf] (%p282_p8), %vm288_vm0, %v952_v0 }
  0x4b   : > { %291 = vst.msk [vmem:[#allocation3] sm:$0xf] (%p282_p8), %vm288_vm0, %v952_v0  ;;  %292 = vst.msk [vmem:[#allocation3 + $0x4] sm:$0xf] (%p282_p8), %vm288_vm0, %v952_v0 }
  0x51 PF: > { %p710_p6 = scmp.ne.s32.totalorder %s938_s18, 0 }
  0x52   : > { %v296_v1 = vld [vmem:[#allocation6] sm:$0xf] (!%p710_p6)  ;;  %v297_v2 = vld [vmem:[#allocation6 + $0x4] sm:$0xf] (!%p710_p6)  ;;  %v298_v3 = vld [vmem:[#allocation6 + $0x8] sm:$0xf] (!%p710_p6) }
  0x53   : > { %295 = sbr.rel (%p710_p6) target bundleno = 113 (0x71), region = 52  ;;  %v299_v4 = vld [vmem:[#allocation6 + $0xc] sm:$0xf] (!%p710_p6)  ;;  %v300_v5 = vld [vmem:[#allocation6 + $0x10] sm:$0xf] (!%p710_p6)  ;;  %v332_v8 = vmul.f32 (!%p710_p6), %v296_v1, %v296_v1  ;;  %v333_v9 = vmul.f32 (!%p710_p6), %v297_v2, %v297_v2  ;;  %v334_v10 = vmul.f32 (!%p710_p6), %v298_v3, %v298_v3  ;;  %vm313_vm1 = vcmask (!%p710_p6), 125952  }
  0x54   : > { %v301_v6 = vld [vmem:[#allocation6 + $0x14] sm:$0xf] (!%p710_p6)  ;;  %v302_v7 = vld [vmem:[#allocation6 + $0x18] sm:$0xf] (!%p710_p6)  ;;  %v303_v11 = vld [vmem:[#allocation6 + $0x1c] sm:$0xf] (!%p710_p6)  ;;  %v335_v15 = vmul.f32 (!%p710_p6), %v299_v4, %v299_v4  ;;  %v336_v17 = vmul.f32 (!%p710_p6), %v300_v5, %v300_v5 }
  0x55   : > { %v314_v12 = vsel (!%p710_p6), %vm313_vm1, %v296_v1, 0.0  ;;  %v315_v13 = vsel (!%p710_p6), %vm313_vm1, %v297_v2, 0.0  ;;  %v317_v14 = vsel (!%p710_p6), %vm313_vm1, %v298_v3, 0.0  ;;  %v337_v18 = vmul.f32 (!%p710_p6), %v301_v6, %v301_v6  ;;  %v304_v28 = vld [vmem:[#allocation9] sm:$0xf] (!%p710_p6) }
  0x56   : > { %v316_v16 = vadd.f32 (!%p710_p6), %v315_v13, %v314_v12  ;;  %v338_v19 = vmul.f32 (!%p710_p6), %v302_v7, %v302_v7  ;;  %v319_v20 = vsel (!%p710_p6), %vm313_vm1, %v299_v4, 0.0  ;;  %v340_v21 = vsel (!%p710_p6), %vm313_vm1, %v332_v8, 0.0  ;;  %v305_v29 = vld [vmem:[#allocation9 + $0x4] sm:$0xf] (!%p710_p6)  ;;  %v306_v33 = vld [vmem:[#allocation9 + $0x8] sm:$0xf] (!%p710_p6) }
  0x57   : > { %v341_v22 = vsel (!%p710_p6), %vm313_vm1, %v333_v9, 0.0  ;;  %v343_v23 = vsel (!%p710_p6), %vm313_vm1, %v334_v10, 0.0  ;;  %v321_v25 = vsel (!%p710_p6), %vm313_vm1, %v300_v5, 0.0  ;;  %v339_v26 = vmul.f32 (!%p710_p6), %v303_v11, %v303_v11  ;;  %v307_v42 = vld [vmem:[#allocation9 + $0xc] sm:$0xf] (!%p710_p6) }
  0x58   : > { %v318_v24 = vadd.f32 (!%p710_p6), %v317_v14, %v316_v16  ;;  %v342_v27 = vadd.f32 (!%p710_p6), %v341_v22, %v340_v21  ;;  %v323_v30 = vsel (!%p710_p6), %vm313_vm1, %v301_v6, 0.0  ;;  %v325_v31 = vsel (!%p710_p6), %vm313_vm1, %v302_v7, 0.0  ;;  %v308_v47 = vld [vmem:[#allocation9 + $0x10] sm:$0xf] (!%p710_p6)  ;;  %v309_v55 = vld [vmem:[#allocation9 + $0x14] sm:$0xf] (!%p710_p6) }
  0x59   : > { %v345_v32 = vsel (!%p710_p6), %vm313_vm1, %v335_v15, 0.0  ;;  %v359_v34 = vsel (!%p710_p6), %vm313_vm1, %v304_v28, 0.0  ;;  %v360_v37 = vsel (!%p710_p6), %vm313_vm1, %v305_v29, 0.0  ;;  %v362_v38 = vsel (!%p710_p6), %vm313_vm1, %v306_v33, 0.0  ;;  %v310_v0 = vld [vmem:[#allocation9 + $0x18] sm:$0xf] (!%p710_p6) }
  0x5a   : > { %v320_v35 = vadd.f32 %v319_v20, %v318_v24  ;;  %v344_v36 = vadd.f32 %v343_v23, %v342_v27  ;;  %v327_v39 = vsel %vm313_vm1, %v303_v11, 0.0  ;;  %v347_v40 = vsel %vm313_vm1, %v336_v17, 0.0  ;;  %v312_v3 = vld [vmem:[#allocation2] sm:$0xf]  ;;  %v311_v10 = vld [vmem:[#allocation9 + $0x1c] sm:$0xf] }
  0x5b   : > { %v349_v41 = vsel %vm313_vm1, %v337_v18, 0.0  ;;  %v361_v43 = vadd.f32 %v360_v37, %v359_v34  ;;  %v351_v46 = vsel %vm313_vm1, %v338_v19, 0.0  ;;  %v364_v48 = vsel %vm313_vm1, %v307_v42, 0.0  ;;  %v331_v13 = vld [vmem:[#allocation3] sm:$0xf] }
  0x5c   : > { %v322_v44 = vadd.f32 %v321_v25, %v320_v35  ;;  %v346_v45 = vadd.f32 %v345_v32, %v344_v36  ;;  %v378_v50 = vmul.f32 %v304_v28, %v304_v28  ;;  %v379_v51 = vmul.f32 %v305_v29, %v305_v29  ;;  %v358_v24 = vld [vmem:[#allocation2 + $0x4] sm:$0xf]  ;;  %v377_v34 = vld [vmem:[#allocation3 + $0x4] sm:$0xf] }
  0x5d   : > { %v363_v49 = vadd.f32 %v362_v38, %v361_v43  ;;  %v380_v52 = vmul.f32 %v306_v33, %v306_v33  ;;  %v366_v56 = vsel %vm313_vm1, %v308_v47, 0.0  ;;  %v381_v57 = vmul.f32 %v307_v42, %v307_v42 }
  0x5e   : > { %v324_v53 = vadd.f32 %v323_v30, %v322_v44  ;;  %v348_v54 = vadd.f32 %v347_v40, %v346_v45  ;;  %v353_v58 = vsel %vm313_vm1, %v339_v26, 0.0  ;;  %v368_v60 = vsel %vm313_vm1, %v309_v55, 0.0 }
  0x5f   : > { %v365_v59 = vadd.f32 %v364_v48, %v363_v49  ;;  %v382_v61 = vmul.f32 %v308_v47, %v308_v47  ;;  %v386_v1 = vsel %vm313_vm1, %v378_v50, 0.0  ;;  %v387_v2 = vsel %vm313_vm1, %v379_v51, 0.0 }
  0x60   : > { %v326_v62 = vadd.f32 %v325_v31, %v324_v53  ;;  %v350_v63 = vadd.f32 %v349_v41, %v348_v54  ;;  %v370_v5 = vsel %vm313_vm1, %v310_v0, 0.0  ;;  %v388_v6 = vadd.f32 %v387_v2, %v386_v1 }
  0x61   : > { %v367_v4 = vadd.f32 %v366_v56, %v365_v59  ;;  %v389_v7 = vsel %vm313_vm1, %v380_v52, 0.0  ;;  %v383_v11 = vmul.f32 %v309_v55, %v309_v55  ;;  %v391_v12 = vsel %vm313_vm1, %v381_v57, 0.0 }
  0x62   : > { %v328_v8 = vadd.f32 %v327_v39, %v326_v62  ;;  %v352_v9 = vadd.f32 %v351_v46, %v350_v63  ;;  %v372_v15 = vsel %vm313_vm1, %v311_v10, 0.0  ;;  %v390_v16 = vadd.f32 %v389_v7, %v388_v6 }
  0x63   : > { %v369_v14 = vadd.f32 %v368_v60, %v367_v4  ;;  %v384_v19 = vmul.f32 %v310_v0, %v310_v0  ;;  %v393_v20 = vsel %vm313_vm1, %v382_v61, 0.0  ;;  %v385_v25 = vmul.f32 %v311_v10, %v311_v10 }
  0x64   : > { %v329_v17 = vadd.f32 %v328_v8, %v312_v3  ;;  %v354_v18 = vadd.f32 %v353_v58, %v352_v9  ;;  %v392_v22 = vadd.f32 %v391_v12, %v390_v16  ;;  %v395_v26 = vsel %vm313_vm1, %v383_v11, 0.0 }
  0x65   : > { %v371_v21 = vadd.f32 %v370_v5, %v369_v14  ;;  %v397_v29 = vsel %vm313_vm1, %v384_v19, 0.0  ;;  %v399_v32 = vsel %vm313_vm1, %v385_v25, 0.0 }
  0x66   : > { %330 = vst.msk [vmem:[#allocation2] sm:$0xf] %vm313_vm1, %v329_v17  ;;  %v355_v23 = vadd.f32 %v354_v18, %v331_v13  ;;  %v394_v28 = vadd.f32 %v393_v20, %v392_v22 }
  0x67   : > { %v373_v27 = vadd.f32 %v372_v15, %v371_v21 }
  0x68   : > { %356 = vst.msk [vmem:[#allocation3] sm:$0xf] %vm313_vm1, %v355_v23  ;;  %v396_v31 = vadd.f32 %v395_v26, %v394_v28 }
  0x69   : > { %v374_v30 = vadd.f32 %v373_v27, %v358_v24 }
  0x6a   : > { %v398_v33 = vadd.f32 %v397_v29, %v396_v31 }
  0x6b   : > { %375 = vst.msk [vmem:[#allocation2 + $0x4] sm:$0xf] %vm313_vm1, %v374_v30 }
  0x6c   : > { %v400_v35 = vadd.f32 %v399_v32, %v398_v33 }
  0x6e   : > { %v401_v36 = vadd.f32 %v400_v35, %v377_v34 }
  0x70   : > { %402 = vst.msk [vmem:[#allocation3 + $0x4] sm:$0xf] %vm313_vm1, %v401_v36 }
  0x71 PF: > { %p403_p4 = scmp.eq.s32.totalorder %s938_s18, 1 }
  0x72   : > { %v408_v37 = vld [vmem:[#allocation2] sm:$0xf] (%p403_p4)  ;;  %vm410_vm2 = vcmask (%p403_p4), 125952   ;;  %v419_v38 = vld [vmem:[#allocation3] sm:$0xf] (%p403_p4)  ;;  %vm443_vm3 = vcmask (%p403_p4), 3072  }
  0x73   : > { %407 = sbr.rel (!%p403_p4) target bundleno = 290 (0x122), region = 56  ;;  %v411_v39 = vsel (%p403_p4), %vm410_vm2, %v408_v37, 0.0  ;;  %v421_v40 = vsel (%p403_p4), %vm410_vm2, %v419_v38, 0.0  ;;  %v409_v41 = vld [vmem:[#allocation2 + $0x4] sm:$0xf] (%p403_p4) }
  0x74   : > { %412 = vadd.xlane.f32.xlu0 (%p403_p4), %v411_v39  ;;  %422 = vadd.xlane.f32.xlu1 (%p403_p4), %v421_v40  ;;  %v414_v43 = vsel (%p403_p4), %vm410_vm2, %v409_v41, 0.0  ;;  %v439_v61 = vld [vmem:[%s1211_s2] sm:$0xf] (%p403_p4)  ;;  %v440_v1 = vld [vmem:[%s1211_s2 + $0x4] sm:$0xf] (%p403_p4) }
  0x75   : > { %v446_v0 = vld [vmem:[%s1212_s3] sm:$0xf] (%p403_p4)  ;;  %v447_v6 = vld [vmem:[%s1212_s3 + $0x4] sm:$0xf] (%p403_p4) }
  0x77   : > { %v420_v42 = vld [vmem:[#allocation3 + $0x4] sm:$0xf] (%p403_p4) }
  0x78   : > { %v424_v44 = vsel (%p403_p4), %vm410_vm2, %v420_v42, 0.0  ;;  %415 = vadd.xlane.f32.xlu0 (%p403_p4), %v414_v43 }
  0x79   : > { %425 = vadd.xlane.f32.xlu1 (%p403_p4), %v424_v44 }
 0x101   : > { %v413_v45 = vpop.xlane.xlu0 %412  ;;  %v423_v46 = vpop.xlane.xlu1 %422 }
 0x102   : > { %v417_v47 = vmul.f32 0.0078125, %v413_v45  ;;  %v427_v48 = vmul.f32 0.0078125, %v423_v46 }
 0x104   : > { %v429_v49 = vmul.f32 %v417_v47, %v417_v47 }
 0x105   : > { %v416_v50 = vpop.xlane.xlu0 %415 }
 0x106   : > { %v426_v51 = vpop.xlane.xlu1 %425  ;;  %v431_v52 = vsub.f32 %v427_v48, %v429_v49  ;;  %v418_v53 = vmul.f32 0.0078125, %v416_v50 }
 0x107   : > { %v428_v54 = vmul.f32 0.0078125, %v426_v51 }
 0x108   : > { %v433_v55 = vmax.f32 %v431_v52, 0.0  ;;  %v430_v56 = vmul.f32 %v418_v53, %v418_v53 }
 0x10a   : > { %v435_v57 = vadd.f32 1e-05, %v433_v55  ;;  %v432_v58 = vsub.f32 %v428_v54, %v430_v56 }
 0x10c   : > { %794 = vrsqrt.f32 %v435_v57  ;;  %v434_v59 = vmax.f32 %v432_v58, 0.0 }
 0x10e   : > { %v436_v60 = vadd.f32 1e-05, %v434_v59 }
 0x110   : > { %796 = vrsqrt.f32 %v436_v60 }
 0x116   : > { %v795_v62 = vpop.eup %794 }
 0x117   : > { %v441_v63 = vmul.f32 %v795_v62, %v439_v61 }
 0x119   : > { %444 = vst.msk [vmem:[#allocation4] sm:$0xf] %vm443_vm3, %v441_v63  ;;  %v448_v2 = vmul.f32 %v441_v63, %v417_v47 }
 0x11a   : > { %v797_v3 = vpop.eup %796 }
 0x11b   : > { %v450_v4 = vsub.f32 %v446_v0, %v448_v2  ;;  %v442_v5 = vmul.f32 %v797_v3, %v440_v1 }
 0x11d   : > { %452 = vst.msk [vmem:[#allocation5] sm:$0xf] %vm443_vm3, %v450_v4  ;;  %445 = vst.msk [vmem:[#allocation4 + $0x4] sm:$0xf] %vm443_vm3, %v442_v5  ;;  %v449_v7 = vmul.f32 %v442_v5, %v418_v53 }
 0x11f   : > { %v451_v8 = vsub.f32 %v447_v6, %v449_v7 }
 0x121   : > { %453 = vst.msk [vmem:[#allocation5 + $0x4] sm:$0xf] %vm443_vm3, %v451_v8 }
 0x122 PF: > { %p712_p9 = scmp.ne.s32.totalorder %s938_s18, 1 }
 0x123   : > { %v473_v10 = vld [vmem:[#allocation4] sm:$0xf] (!%p712_p9)  ;;  %v953_v11 = vmov (!%p712_p9), 0   ;;  %v457_v14 = vld [vmem:[#allocation6] sm:$0xf] (!%p712_p9)  ;;  %vm501_vm4 = vcmask (!%p712_p9), 125952  }
 0x124   : > { %456 = sbr.rel (%p712_p9) target bundleno = 434 (0x1b2), region = 60  ;;  %v487_v9 = vld [vmem:[#allocation5] sm:$0xf] (!%p712_p9)  ;;  %799 = vset.pattern.permute.xlu1 (!%p712_p9), %v953_v11  ;;  %798 = vset.pattern.permute.xlu0 (!%p712_p9), %v953_v11  ;;  %v511_v13 = vld [vmem:[#allocation4 + $0x4] sm:$0xf] (!%p712_p9) }
 0x125   : > { %490 = vperm.xlu1 (!%p712_p9), %799, %v487_v9   ;;  %476 = vperm.xlu0 (!%p712_p9), %798, %v473_v10   ;;  %v458_v15 = vld [vmem:[#allocation6 + $0x4] sm:$0xf] (!%p712_p9)  ;;  %v459_v16 = vld [vmem:[#allocation6 + $0x8] sm:$0xf] (!%p712_p9)  ;;  %v460_v17 = vld [vmem:[#allocation6 + $0xc] sm:$0xf] (!%p712_p9) }
 0x126   : > { %v461_v18 = vld [vmem:[#allocation6 + $0x10] sm:$0xf] (!%p712_p9)  ;;  %v462_v19 = vld [vmem:[#allocation6 + $0x14] sm:$0xf] (!%p712_p9)  ;;  %v463_v20 = vld [vmem:[#allocation6 + $0x18] sm:$0xf] (!%p712_p9) }
 0x127   : > { %v464_v21 = vld [vmem:[#allocation6 + $0x1c] sm:$0xf] (!%p712_p9)  ;;  %v465_v28 = vld [vmem:[#allocation9] sm:$0xf] (!%p712_p9)  ;;  %v466_v29 = vld [vmem:[#allocation9 + $0x4] sm:$0xf] (!%p712_p9) }
 0x128   : > { %v526_v12 = vld [vmem:[#allocation5 + $0x4] sm:$0xf] (!%p712_p9)  ;;  %v467_v34 = vld [vmem:[#allocation9 + $0x8] sm:$0xf] (!%p712_p9)  ;;  %v468_v35 = vld [vmem:[#allocation9 + $0xc] sm:$0xf] (!%p712_p9) }
 0x129   : > { %529 = vperm.xlu1 (!%p712_p9), %799, %v526_v12   ;;  %514 = vperm.xlu0 (!%p712_p9), %798, %v511_v13   ;;  %v469_v36 = vld [vmem:[#allocation9 + $0x10] sm:$0xf] (!%p712_p9)  ;;  %v470_v41 = vld [vmem:[#allocation9 + $0x14] sm:$0xf] (!%p712_p9)  ;;  %v471_v42 = vld [vmem:[#allocation9 + $0x18] sm:$0xf] (!%p712_p9) }
 0x12a   : > { %v472_v43 = vld [vmem:[#allocation9 + $0x1c] sm:$0xf] (!%p712_p9) }
 0x1a4   : > { %v491_v22 = vpop.permute.xlu1 %490  ;;  %v477_v23 = vpop.permute.xlu0 %476 }
 0x1a5   : > { %v479_v24 = vmul.f32 %v477_v23, %v457_v14  ;;  %v480_v25 = vmul.f32 %v477_v23, %v458_v15  ;;  %v481_v26 = vmul.f32 %v477_v23, %v459_v16  ;;  %v482_v27 = vmul.f32 %v477_v23, %v460_v17 }
 0x1a6   : > { %v483_v30 = vmul.f32 %v477_v23, %v461_v18  ;;  %v484_v31 = vmul.f32 %v477_v23, %v462_v19  ;;  %v485_v32 = vmul.f32 %v477_v23, %v463_v20  ;;  %v486_v33 = vmul.f32 %v477_v23, %v464_v21 }
 0x1a7   : > { %v493_v37 = vadd.f32 %v491_v22, %v479_v24  ;;  %v494_v38 = vadd.f32 %v491_v22, %v480_v25  ;;  %v495_v39 = vadd.f32 %v491_v22, %v481_v26  ;;  %v496_v40 = vadd.f32 %v491_v22, %v482_v27 }
 0x1a8   : > { %v497_v44 = vadd.f32 %v491_v22, %v483_v30  ;;  %v498_v45 = vadd.f32 %v491_v22, %v484_v31  ;;  %v499_v46 = vadd.f32 %v491_v22, %v485_v32  ;;  %v500_v47 = vadd.f32 %v491_v22, %v486_v33  ;;  %v515_v48 = vpop.permute.xlu0 %514  ;;  %v530_v53 = vpop.permute.xlu1 %529 }
 0x1a9   : > { %502 = vst.msk [vmem:[#allocation11] sm:$0xf] %vm501_vm4, %v493_v37  ;;  %503 = vst.msk [vmem:[#allocation11 + $0x4] sm:$0xf] %vm501_vm4, %v494_v38  ;;  %v517_v49 = vmul.f32 %v515_v48, %v465_v28  ;;  %v518_v50 = vmul.f32 %v515_v48, %v466_v29  ;;  %v519_v51 = vmul.f32 %v515_v48, %v467_v34 }
 0x1aa   : > { %504 = vst.msk [vmem:[#allocation11 + $0x8] sm:$0xf] %vm501_vm4, %v495_v39  ;;  %505 = vst.msk [vmem:[#allocation11 + $0xc] sm:$0xf] %vm501_vm4, %v496_v40  ;;  %v520_v52 = vmul.f32 %v515_v48, %v468_v35  ;;  %v521_v54 = vmul.f32 %v515_v48, %v469_v36  ;;  %v522_v55 = vmul.f32 %v515_v48, %v470_v41 }
 0x1ab   : > { %506 = vst.msk [vmem:[#allocation11 + $0x10] sm:$0xf] %vm501_vm4, %v497_v44  ;;  %507 = vst.msk [vmem:[#allocation11 + $0x14] sm:$0xf] %vm501_vm4, %v498_v45  ;;  %v523_v56 = vmul.f32 %v515_v48, %v471_v42  ;;  %v524_v57 = vmul.f32 %v515_v48, %v472_v43  ;;  %v532_v58 = vadd.f32 %v530_v53, %v517_v49 }
 0x1ac   : > { %508 = vst.msk [vmem:[#allocation11 + $0x18] sm:$0xf] %vm501_vm4, %v499_v46  ;;  %509 = vst.msk [vmem:[#allocation11 + $0x1c] sm:$0xf] %vm501_vm4, %v500_v47  ;;  %v533_v59 = vadd.f32 %v530_v53, %v518_v50  ;;  %v534_v60 = vadd.f32 %v530_v53, %v519_v51  ;;  %v535_v61 = vadd.f32 %v530_v53, %v520_v52 }
 0x1ad   : > { %v536_v62 = vadd.f32 %v530_v53, %v521_v54  ;;  %v537_v63 = vadd.f32 %v530_v53, %v522_v55  ;;  %v538_v0 = vadd.f32 %v530_v53, %v523_v56  ;;  %v539_v1 = vadd.f32 %v530_v53, %v524_v57  ;;  %540 = vst.msk [vmem:[#allocation12] sm:$0xf] %vm501_vm4, %v532_v58 }
 0x1ae   : > { %541 = vst.msk [vmem:[#allocation12 + $0x4] sm:$0xf] %vm501_vm4, %v533_v59  ;;  %542 = vst.msk [vmem:[#allocation12 + $0x8] sm:$0xf] %vm501_vm4, %v534_v60 }
 0x1af   : > { %543 = vst.msk [vmem:[#allocation12 + $0xc] sm:$0xf] %vm501_vm4, %v535_v61  ;;  %544 = vst.msk [vmem:[#allocation12 + $0x10] sm:$0xf] %vm501_vm4, %v536_v62 }
 0x1b0   : > { %545 = vst.msk [vmem:[#allocation12 + $0x14] sm:$0xf] %vm501_vm4, %v537_v63  ;;  %546 = vst.msk [vmem:[#allocation12 + $0x18] sm:$0xf] %vm501_vm4, %v538_v0 }
 0x1b1   : > { %547 = vst.msk [vmem:[#allocation12 + $0x1c] sm:$0xf] %vm501_vm4, %v539_v1 }
 0x1b2 PF: > { %p1157_p10 = scmp.eq.s32.totalorder %s701_s21, 1  ;;  %s954_s17 = smov [#allocation11]  }
 0x1b3   : > { %s568_s26 = sshll.u32 %s954_s17, 4  ;;  %s569_s26 = int_to_ptr.vmem [resolvable:$true] %s568_s26 }
 0x1b4   : > { %s856_s29 = scalar_lea.vmem %s569_s26, 512  ;;  %s862_s6 = scalar_lea.vmem %s569_s26, 1024 }
 0x1b5   : > { %p857_p11 = scmp.ne.s32.totalorder %s569_s26, %s856_s29  ;;  %p863_p0 = scmp.lt.s32.totalorder %s569_s26, %s569_s26 }
 0x1b6   : > { %p864_p1 = scmp.lt.s32.totalorder %s862_s6, %s856_s29 }
 0x1b7   : > { %p858_p12 = pnand %p857_p11, %p1157_p10 }
 0x1b8   : > { %p865_p2 = por %p864_p1, %p863_p0 }
 0x1b9   : > { %p859_p13 = pneg %p858_p12 }
 0x1bb   : > { %p866_p5 = pnand %p865_p2, %p859_p13 }
 0x1bd   : > { %869 = shalt.err (!%p866_p5)
}
 0x1be   : > { %s870_s8 = scalar_lea.hbm %s1213_s4, 512 }
 0x1bf   : > { %p871_p7 = scmp.ne.s32.totalorder %s1213_s4, %s870_s8  ;;  %p876_p6 = scmp.lt.u32.totalorder %s870_s8, %s1213_s4 }
 0x1c1   : > { %p872_p3 = pnand %p871_p7, %p1157_p10 }
 0x1c3   : > { %p873_p8 = pneg %p872_p3 }
 0x1c5   : > { %p878_p4 = pnand %p876_p6, %p873_p8 }
 0x1c7   : > { %881 = shalt.err (!%p878_p4)
}
 0x1c8   : > { %s955_s12 = smov 64   ;;  %s956_s24 = smov 4  }
 0x1c9   : > { %730 = dma.vmem_to_hbm [thread:$0]  (%p1157_p10), %s569_s26, 512, %s1213_s4, [#allocation8], %s955_s12, %s955_s12, %s956_s24  }
 0x1ca   : > { %s957_s30 = smov [#allocation12]  }
 0x1cb   : > { %s585_s13 = sshll.u32 %s957_s30, 4  ;;  %s586_s13 = int_to_ptr.vmem [resolvable:$true] %s585_s13 }
 0x1cc   : > { %s882_s14 = scalar_lea.vmem %s586_s13, 512  ;;  %s888_s15 = scalar_lea.vmem %s586_s13, 1024 }
 0x1cd   : > { %p883_p9 = scmp.ne.s32.totalorder %s586_s13, %s882_s14  ;;  %p889_p13 = scmp.lt.s32.totalorder %s586_s13, %s586_s13 }
 0x1ce   : > { %p890_p0 = scmp.lt.s32.totalorder %s888_s15, %s882_s14 }
 0x1cf   : > { %p884_p11 = pnand %p883_p9, %p1157_p10 }
 0x1d0   : > { %p891_p1 = por %p890_p0, %p889_p13 }
 0x1d1   : > { %p885_p12 = pneg %p884_p11 }
 0x1d3   : > { %p892_p2 = pnand %p891_p1, %p885_p12 }
 0x1d5   : > { %895 = shalt.err (!%p892_p2)
}
 0x1d6   : > { %s896_s29 = scalar_lea.hbm %s1214_s5, 512 }
 0x1d7   : > { %p897_p5 = scmp.ne.s32.totalorder %s1214_s5, %s896_s29  ;;  %p902_p8 = scmp.lt.u32.totalorder %s896_s29, %s1214_s5 }
 0x1d9   : > { %p898_p7 = pnand %p897_p5, %p1157_p10 }
 0x1db   : > { %p899_p3 = pneg %p898_p7 }
 0x1dd   : > { %p904_p6 = pnand %p902_p8, %p899_p3 }
 0x1df   : > { %907 = shalt.err (!%p904_p6)
}
 0x1e0   : > { %732 = dma.vmem_to_hbm [thread:$0]  (%p1157_p10), %s586_s13, 512, %s1214_s5, [#allocation13], %s955_s12, %s955_s12, %s956_s24  }
 0x1e1 PF: > { %p757_p4 = scmp.ge.s32.totalorder %s946_s20, 2  ;;  %p758_p9 = scmp.eq.s32.totalorder %s702_s22, 1 }
 0x1e3   : > { %p745_p11 = pnand %p758_p9, %p757_p4 }
 0x1e5   : > { %929 = dma.done.wait (!%p745_p11), [#allocation8], 512  }
 0x1e6   : > { %931 = vsyncadd (!%p745_p11), [#allocation8], 4294966784 }
 0x1e7   : > { %933 = dma.done.wait (!%p745_p11), [#allocation13], 512  }
 0x1e8   : > { %935 = vsyncadd (!%p745_p11), [#allocation13], 4294966784  ;;  %s24_s20 = sadd.s32 1, %s946_s20   ;;  %s1224_s18 = smov %s942_s19 }
 0x1e9   : > { %p21_p12 = scmp.ge.s32.totalorder %s24_s20, 4   ;;  %s1225_s19 = smov %s1227_s23 }
 0x1eb   :  { %23 = sbr.rel (!%p21_p12) target bundleno = 7 (0x7), region = 116 }
 0x1f2   :  { %615 = vsyncpa [#allocation7], 1 }
 0x1f3   :  { %617 = vsyncpa [#allocation7 + $0x1], 1 }
 0x1f4   :  { %618 = vsyncpa [#allocation10], 1 }
 0x1f5   :  { %619 = vsyncpa [#allocation8], 1 }
 0x1f6   :  { %621 = vsyncpa [#allocation8 + $0x1], 1 }
 0x1f7   :  { %622 = vsyncpa [#allocation13], 1 }
 0x1f8   :  { %624 = vsyncpa [#allocation13 + $0x1], 1 }

</bundles_post_ra>
